<compile_context>
chip_gen: v7x
topology: tpu7x:2x2x1
jax: 0.10.0
libtpu: 0.0.40
codegen_flags: <defaults>
</compile_context>

<pallas_src>
import functools

import jax
import jax.numpy as jnp
from jax.experimental import pallas as pl
from jax.experimental.pallas import tpu as pltpu


_NEG_CAM = -10000.0
_HARD_SCALE = 1.0 + 0.012
_HARD_SHIFT = 0.012
_SUBLANE = 32  # int8 camera mask rides along -> use the int8 native sublane tile


def _coscam_kernel(x_ref, pm_ref, t_ref, gt_ref, out_ref, *,
                   scale, margin, batch, block_rows):
    # x_ref: (TB, C) storage dtype; pm_ref: (TB, C) int8; t_ref/gt_ref: (TB, 1);
    # out_ref: (1, 8, 128) f32 lane-dense partial-sum slab.
    x = x_ref[...].astype(jnp.float32)
    pm = pm_ref[...]
    t = t_ref[...]                                            # (TB, 1) int32
    gt = gt_ref[...].astype(jnp.float32)                      # (TB, 1)
    tb, c = x.shape

    col_ids = jax.lax.broadcasted_iota(jnp.int32, (tb, c), 1)
    is_tgt = col_ids == t                                     # (TB, C) bool

    # camera-masked logits: binary mask -> one select instead of 2 muls + 2 adds
    cam = jnp.where(pm != 0, x, _NEG_CAM)
    # hard-example boost
    x_boost = jnp.where(cam >= gt, _HARD_SCALE * x + _HARD_SHIFT, x)

    # target column is analytically scale*(gt - margin): fuses the gt scatter-back
    # and the CosFace margin into a single select (no materialized one_hot).
    tgt_logit = scale * (gt - margin)                         # (TB, 1)
    logits = jnp.where(is_tgt, tgt_logit, scale * x_boost)    # (TB, C)

    # numerically stable per-row cross entropy: lse(logits) - logits[target]
    row_max = jnp.max(logits, axis=-1, keepdims=True)
    lse = row_max + jnp.log(
        jnp.sum(jnp.exp(logits - row_max), axis=-1, keepdims=True))
    per_row = lse - tgt_logit                                 # (TB, 1)

    # mask rows of the ragged last tile (big inputs are NOT padded in HBM)
    row_ids = pl.program_id(0) * block_rows + jax.lax.broadcasted_iota(
        jnp.int32, (tb, 1), 0)
    per_row = jnp.where(row_ids < batch, per_row, 0.0)

    # lane-dense partial-sum slab (avoids masked (1,1) stores; final mean in wrapper)
    out_ref[...] = jnp.full(out_ref.shape, jnp.sum(per_row), dtype=jnp.float32)


def _round_up(x, m):
    return (x + m - 1) // m * m


def _vmem_caps():
    # generation-aware scoped-VMEM cap (v7x: 64 MiB physical; v5e/v6e: 128 MiB)
    try:
        phys = int(pltpu.get_tpu_info().vmem_capacity_bytes)
    except Exception:
        phys = 64 << 20                        # conservative (v7x-sized) fallback
    limit_cap = min(phys // 2, 64 << 20)       # v5e/v6e -> 64 MiB, v7x -> 32 MiB
    tile_budget = max(8 << 20, limit_cap // 2)
    return limit_cap, tile_budget


def _choose_block_rows(batch, num_classes, in_bytes, mask_bytes, tile_budget):
    # VMEM per row per pipeline stage: double-buffered input tiles + the f32
    # intermediates the body materializes (~6 (TB,C) f32 slabs) + lane-padded
    # (TB,128) targets/gt blocks.
    per_row = (2 * num_classes * (in_bytes + mask_bytes)
               + 6 * num_classes * 4
               + 2 * 128 * 4)
    tb = tile_budget // max(per_row, 1)
    # keep >= ~8 grid steps so the DMA/compute pipeline (and both v7x TensorCores
    # under "parallel" megacore sharding) stays busy
    tb = min(tb, _round_up((batch + 7) // 8, _SUBLANE))
    tb = max(_SUBLANE, (tb // _SUBLANE) * _SUBLANE)
    return int(tb)


def coscam_loss(inputs, targets, mask=None, pos_cam_mask=None, *,
                scale=16.0, margin=0.1, block_rows=None):
    """inputs: (B, C) float, targets: (B,) int, pos_cam_mask: (B, C) {0,1}.

    `mask` mirrors the PyTorch signature but is ignored (the reference forward
    overwrites it internally). Returns the scalar float32 loss.
    """
    del mask
    assert pos_cam_mask is not None
    B, C = inputs.shape
    in_bytes = inputs.dtype.itemsize
    mask_bytes = 1  # camera mask goes over the DMA as int8

    limit_cap, tile_budget = _vmem_caps()
    if block_rows is None:
        block_rows = _choose_block_rows(B, C, in_bytes, mask_bytes, tile_budget)
    tb = int(block_rows)
    assert tb % _SUBLANE == 0, (tb, _SUBLANE)

    num_tiles = (B + tb - 1) // tb
    b_pad = num_tiles * tb

    # cheap wrapper-side prep: binary mask as int8 and the target-column gather
    # (drops a full-row reduce + a select from the kernel). The big (B,C) arrays
    # are NOT padded/copied; the ragged last tile is masked in-kernel.
    pm8 = (pos_cam_mask != 0).astype(jnp.int8)
    tgt = targets.astype(jnp.int32)
    gt = jnp.take_along_axis(inputs, tgt[:, None], axis=1).astype(jnp.float32)
    t2d = tgt[:, None]
    if b_pad != B:  # only the tiny (B,1) per-row arrays get padded
        t2d = jnp.pad(t2d, ((0, b_pad - B), (0, 0)))
        gt = jnp.pad(gt, ((0, b_pad - B), (0, 0)))

    kernel = functools.partial(
        _coscam_kernel, scale=float(scale), margin=float(margin),
        batch=B, block_rows=tb)

    vmem_need = (2 * tb * C * (in_bytes + mask_bytes)   # double-buffered input tiles
                 + 6 * tb * C * 4                       # f32 body intermediates
                 + 4 * tb * 128 * 4                     # lane-padded targets/gt blocks
                 + 2 * 8 * 128 * 4)                     # output slab
    vmem_limit = int(min(limit_cap, max(16 << 20, vmem_need + (4 << 20))))

    grid_spec = pltpu.PrefetchScalarGridSpec(
        num_scalar_prefetch=0,
        grid=(num_tiles,),
        in_specs=[
            pl.BlockSpec((tb, C), lambda i: (i, 0)),    # inputs tile
            pl.BlockSpec((tb, C), lambda i: (i, 0)),    # int8 camera-mask tile
            pl.BlockSpec((tb, 1), lambda i: (i, 0)),    # targets tile
            pl.BlockSpec((tb, 1), lambda i: (i, 0)),    # gt tile
        ],
        out_specs=pl.BlockSpec((1, 8, 128), lambda i: (i, 0, 0)),
    )

    cost = pl.CostEstimate(
        flops=int(15 * B * C),
        transcendentals=int(B * C),
        bytes_accessed=int(B * C * (in_bytes + mask_bytes) + B * 8
                           + num_tiles * 8 * 128 * 4),
    )

    partials = pl.pallas_call(
        kernel,
        out_shape=jax.ShapeDtypeStruct((num_tiles, 8, 128), jnp.float32),
        grid_spec=grid_spec,
        compiler_params=pltpu.CompilerParams(
            dimension_semantics=("parallel",),
            vmem_limit_bytes=vmem_limit,
        ),
        cost_estimate=cost,
    )(inputs, pm8, t2d, gt)

    # each grid step broadcast its partial sum over an (8,128) slab; read one lane per tile
    return jnp.sum(partials[:, 0, 0]) / jnp.float32(B)


def _reference_coscam(inputs, targets, pos_cam_mask, scale=16.0, margin=0.1):
    x = inputs.astype(jnp.float32)
    pm = pos_cam_mask.astype(jnp.float32)
    C = x.shape[1]
    one_hot = jax.nn.one_hot(targets, C, dtype=jnp.float32)
    cam = pm * x + (1.0 - pm) * _NEG_CAM
    gt = jnp.take_along_axis(x, targets[:, None].astype(jnp.int32), axis=1)   # (B, 1)
    hard = cam >= gt
    x_mod = jnp.where(hard, _HARD_SCALE * x + _HARD_SHIFT, x)
    x_mod = jnp.where(one_hot > 0, gt, x_mod)
    logits = scale * (x_mod - one_hot * margin)
    logp = jax.nn.log_softmax(logits, axis=-1)
    return -jnp.mean(jnp.take_along_axis(logp, targets[:, None], axis=1))


if __name__ == "__main__":
    key = jax.random.PRNGKey(0)
    k_x, k_t, k_m = jax.random.split(key, 3)

    # small shapes; B deliberately NOT a multiple of the 32-row tile so the
    # unpadded ragged last tile (row-validity mask) is exercised, C = 3*128 lanes
    B, C = 80, 384
    inputs = jax.random.normal(k_x, (B, C), dtype=jnp.float32)
    targets = jax.random.randint(k_t, (B,), 0, C, dtype=jnp.int32)
    pos_cam_mask = jax.random.bernoulli(k_m, 0.5, (B, C)).astype(jnp.float32)

    ref = _reference_coscam(inputs, targets, pos_cam_mask, scale=16.0, margin=0.1)

    # explicit small tile -> 3 pipelined grid steps with a masked ragged tail
    loss = coscam_loss(inputs, targets, None, pos_cam_mask,
                       scale=16.0, margin=0.1, block_rows=32)
    jax.block_until_ready(loss)
    assert jnp.allclose(loss, ref, atol=1e-4, rtol=1e-4), (loss, ref)

    # auto tile-size path (generation-aware VMEM budget, >= multiple grid steps)
    loss2 = coscam_loss(inputs, targets, None, pos_cam_mask, scale=16.0, margin=0.1)
    jax.block_until_ready(loss2)
    assert jnp.allclose(loss2, ref, atol=1e-4, rtol=1e-4), (loss2, ref)

    print("KERNEL_OK")
</pallas_src>

<mosaic_0001>
module attributes {stable_mosaic.version = 11 : i64} {
  func.func @_coscam_kernel(%arg0: i32, %arg1: memref<32x384xf32, #tpu.memory_space<vmem>>, %arg2: memref<32x384xi8, #tpu.memory_space<vmem>>, %arg3: memref<32x1xi32, #tpu.memory_space<vmem>>, %arg4: memref<32x1xf32, #tpu.memory_space<vmem>>, %arg5: memref<1x8x128xf32, #tpu.memory_space<vmem>>) attributes {dimension_semantics = [#tpu.dimension_semantics<parallel>], iteration_bounds = array<i64: 3>, scalar_prefetch = 0 : i64, scratch_operands = 0 : i64, tpu.core_type = #tpu.core_type<tc>, window_params = [{transform_indices = @transform_0, window_bounds = array<i64: 32, 384>}, {transform_indices = @transform_1, window_bounds = array<i64: 32, 384>}, {transform_indices = @transform_2, window_bounds = array<i64: 32, 1>}, {transform_indices = @transform_3, window_bounds = array<i64: 32, 1>}, {transform_indices = @transform_4, window_bounds = array<i64: 1, 8, 128>}]} {
    %c0 = arith.constant 0 : index
    %c0_0 = arith.constant 0 : index
    %0 = vector.load %arg1[%c0, %c0_0] : memref<32x384xf32, #tpu.memory_space<vmem>>, vector<32x384xf32>
    %c0_1 = arith.constant 0 : index
    %c0_2 = arith.constant 0 : index
    %1 = vector.load %arg2[%c0_1, %c0_2] : memref<32x384xi8, #tpu.memory_space<vmem>>, vector<32x384xi8>
    %c0_3 = arith.constant 0 : index
    %c0_4 = arith.constant 0 : index
    %2 = vector.load %arg3[%c0_3, %c0_4] : memref<32x1xi32, #tpu.memory_space<vmem>>, vector<32x1xi32>
    %c0_5 = arith.constant 0 : index
    %c0_6 = arith.constant 0 : index
    %3 = vector.load %arg4[%c0_5, %c0_6] : memref<32x1xf32, #tpu.memory_space<vmem>>, vector<32x1xf32>
    %4 = tpu.iota {dimensions = array<i32: 1>} : vector<32x384xi32>
    %5 = vector.broadcast %2 : vector<32x1xi32> to vector<32x384xi32>
    %6 = arith.cmpi eq, %4, %5 : vector<32x384xi32>
    %c0_i8 = arith.constant 0 : i8
    %7 = vector.broadcast %c0_i8 : i8 to vector<32x384xi8>
    %8 = arith.cmpi ne, %1, %7 : vector<32x384xi8>
    %cst = arith.constant -1.000000e+04 : f32
    %9 = vector.broadcast %cst : f32 to vector<32x384xf32>
    %10 = arith.select %8, %0, %9 : vector<32x384xi1>, vector<32x384xf32>
    %11 = vector.broadcast %3 : vector<32x1xf32> to vector<32x384xf32>
    %12 = arith.cmpf oge, %10, %11 : vector<32x384xf32>
    %cst_7 = arith.constant 1.012000e+00 : f32
    %13 = vector.broadcast %cst_7 : f32 to vector<32x384xf32>
    %14 = arith.mulf %13, %0 : vector<32x384xf32>
    %cst_8 = arith.constant 1.200000e-02 : f32
    %15 = vector.broadcast %cst_8 : f32 to vector<32x384xf32>
    %16 = arith.addf %14, %15 : vector<32x384xf32>
    %17 = arith.select %12, %16, %0 : vector<32x384xi1>, vector<32x384xf32>
    %cst_9 = arith.constant 1.000000e-01 : f32
    %18 = vector.broadcast %cst_9 : f32 to vector<32x1xf32>
    %19 = arith.subf %3, %18 : vector<32x1xf32>
    %cst_10 = arith.constant 1.600000e+01 : f32
    %20 = vector.broadcast %cst_10 : f32 to vector<32x1xf32>
    %21 = arith.mulf %20, %19 : vector<32x1xf32>
    %cst_11 = arith.constant 1.600000e+01 : f32
    %22 = vector.broadcast %cst_11 : f32 to vector<32x384xf32>
    %23 = arith.mulf %22, %17 : vector<32x384xf32>
    %24 = vector.shape_cast %21 : vector<32x1xf32> to vector<32x1xf32>
    %25 = vector.broadcast %24 : vector<32x1xf32> to vector<32x384xf32>
    %26 = arith.select %6, %25, %23 : vector<32x384xi1>, vector<32x384xf32>
    %cst_12 = arith.constant dense<0xFF800000> : vector<32xf32>
    %27 = vector.multi_reduction <maximumf>, %26, %cst_12 [1] : vector<32x384xf32> to vector<32xf32>
    %28 = vector.shape_cast %27 : vector<32xf32> to vector<32x1xf32>
    %29 = vector.broadcast %28 : vector<32x1xf32> to vector<32x384xf32>
    %30 = arith.subf %26, %29 : vector<32x384xf32>
    %31 = math.exp %30 : vector<32x384xf32>
    %cst_13 = arith.constant dense<0.000000e+00> : vector<32xf32>
    %32 = vector.multi_reduction <add>, %31, %cst_13 [1] : vector<32x384xf32> to vector<32xf32>
    %33 = vector.shape_cast %32 : vector<32xf32> to vector<32x1xf32>
    %34 = math.log %33 : vector<32x1xf32>
    %35 = arith.addf %28, %34 : vector<32x1xf32>
    %36 = arith.subf %35, %21 : vector<32x1xf32>
    %c32_i32 = arith.constant 32 : i32
    %37 = arith.muli %arg0, %c32_i32 : i32
    %38 = tpu.iota {dimensions = array<i32: 0>} : vector<32x1xi32>
    %39 = vector.broadcast %37 : i32 to vector<32x1xi32>
    %40 = arith.addi %39, %38 : vector<32x1xi32>
    %c80_i32 = arith.constant 80 : i32
    %41 = vector.broadcast %c80_i32 : i32 to vector<32x1xi32>
    %42 = arith.cmpi slt, %40, %41 : vector<32x1xi32>
    %cst_14 = arith.constant 0.000000e+00 : f32
    %43 = vector.broadcast %cst_14 : f32 to vector<32x1xf32>
    %44 = arith.select %42, %36, %43 : vector<32x1xi1>, vector<32x1xf32>
    %45 = vector.shape_cast %44 : vector<32x1xf32> to vector<1x32x1xf32>
    %cst_15 = arith.constant dense<0.000000e+00> : vector<1xf32>
    %46 = vector.multi_reduction <add>, %45, %cst_15 [1, 2] : vector<1x32x1xf32> to vector<1xf32>
    %47 = vector.shape_cast %46 : vector<1xf32> to vector<1x1x1xf32>
    %48 = vector.extract %47[0, 0, 0] : f32 from vector<1x1x1xf32>
    %49 = vector.broadcast %48 : f32 to vector<1x8x128xf32>
    %c0_16 = arith.constant 0 : index
    %c0_17 = arith.constant 0 : index
    %c0_18 = arith.constant 0 : index
    %50 = vector.load %arg5[%c0_16, %c0_17, %c0_18] : memref<1x8x128xf32, #tpu.memory_space<vmem>>, vector<1x8x128xf32>
    tpu.vector_store %arg5[%c0_16, %c0_17, %c0_18], %49 {strides = array<i32>} : memref<1x8x128xf32, #tpu.memory_space<vmem>>, vector<1x8x128xf32>,
    return
  }
  func.func @transform_0(%arg0: i32) -> (i32, i32) {
    %c0_i32 = arith.constant 0 : i32
    %c0_i32_0 = arith.constant 0 : i32
    return %arg0, %c0_i32 : i32, i32
  }
  func.func @transform_1(%arg0: i32) -> (i32, i32) {
    %c0_i32 = arith.constant 0 : i32
    %c0_i32_0 = arith.constant 0 : i32
    return %arg0, %c0_i32 : i32, i32
  }
  func.func @transform_2(%arg0: i32) -> (i32, i32) {
    %c0_i32 = arith.constant 0 : i32
    %c0_i32_0 = arith.constant 0 : i32
    return %arg0, %c0_i32 : i32, i32
  }
  func.func @transform_3(%arg0: i32) -> (i32, i32) {
    %c0_i32 = arith.constant 0 : i32
    %c0_i32_0 = arith.constant 0 : i32
    return %arg0, %c0_i32 : i32, i32
  }
  func.func @transform_4(%arg0: i32) -> (i32, i32, i32) {
    %c0_i32 = arith.constant 0 : i32
    %c0_i32_0 = arith.constant 0 : i32
    %c0_i32_1 = arith.constant 0 : i32
    return %arg0, %c0_i32, %c0_i32_0 : i32, i32, i32
  }
}

</mosaic_0001>

<bundles_post_ra>
// kernel: tpu_custom_call.1
= control target key start
LH: loop header
LB: loop body
LE: loop exit
PB: predicated region body
PF: predicated region fallthrough
CT: control target
= control target key end

     0   :  { %9 = vsyncpa [#allocation3], 0  ;;  %s1509_s0 = inlined_call_operand.hbm [shape: f32[80,384], index: 0, kind: input, shape index: {}]   ;;  %s1510_s1 = inlined_call_operand.vmem [shape: s8[80,384], index: 1, kind: input, shape index: {}]   ;;  %s1511_s2 = inlined_call_operand.vmem [shape: s32[96,1], index: 2, kind: input, shape index: {}]   ;;  %s1512_s3 = inlined_call_operand.vmem [shape: f32[96,1], index: 3, kind: input, shape index: {}]   ;;  %s1513_s4 = inlined_call_operand.hbm [shape: f32[3,8,128], index: 4, kind: output, shape index: {}]  }
   0x1   :  { %11 = vsyncpa [#allocation3 + $0x1], 0 }
   0x2   :  { %12 = vsyncpa [#allocation4], 0 }
   0x3   :  { %14 = vsyncpa [#allocation4 + $0x1], 0  ;;  %s1020_s15 = smov 0   ;;  %s1022_s16 = smov 0  }
   0x4   :  { %s1024_s17 = smov 0   ;;  %s1026_s18 = smov 0  }
   0x5 LB: > { %s1041_s19 = sadd.s32 4294967295, %s988_s18   ;;  %s784_s20 = sadd.s32 4294967294, %s988_s18   ;;  %s988_s18 = sphi %s1026_s18, %s1569_s18   ;;  %s984_s17 = sphi %s1024_s17, %s1568_s17   ;;  %s980_s16 = sphi %s1022_s16, %s1567_s16   ;;  %s976_s15 = sphi %s1020_s15, %s1566_s15  }
   0x6   : > { %s1045_s21 = sadd.s32 1, %s988_s18   ;;  %s27_s22 = sadd.s32 1, %s984_s17 }
   0x7   : > { %s24_s23 = ssub.s32 %s988_s18, %s1045_s21  ;;  %p34_p0 = scmp.ne.s32.totalorder %s984_s17, %s980_s16 }
   0x8   : > { %p25_p1 = scmp.eq.s32.totalorder %s24_s23, 0  ;;  %p35_p2 = scmp.eq.s32.totalorder %s988_s18, 0 }
   0x9   : > { %p40_p3 = scmp.ne.s32.totalorder %s980_s16, %s976_s15  ;;  %p41_p4 = scmp.eq.s32.totalorder %s1041_s19, 0 }
   0xa   : > { %s1057_s24 = scalar_select %p25_p1, %s984_s17, %s27_s22  }
   0xb   : > { %p36_p5 = por %p35_p2, %p34_p0  ;;  %p1059_p6 = por %p41_p4, %p40_p3 }
   0xc   : > { %p142_p7 = scmp.eq.s32.totalorder %s1041_s19, 2  ;;  %p148_p8 = scmp.eq.s32.totalorder %s784_s20, 2 }
   0xd   : > { %p786_p11 = scmp.ge.s32.totalorder %s988_s18, 3 }
   0xe   : > { %p1064_p9 = por %p142_p7, %p34_p0  ;;  %p1068_p10 = por %p148_p8, %p40_p3 }
   0xf   : > { %164 = sbr.rel (%p786_p11) target bundleno = 58 (0x3a), region = 16 }
  0x10   : > { %s1516_s27 = scalar_select %p1068_p10, 1, 0 }
  0x16   : > { %167 = sbr.rel (!%p36_p5) target bundleno = 58 (0x3a), region = 20  ;;  %s168_s28 = sand.u32 (%p36_p5), 1, %s984_s17  }
  0x17   : > { %s787_s29 = sshll.u32 (%p36_p5), %s988_s18, 2  ;;  %s811_s30 = smul.u32 (%p36_p5), 96, %s168_s28 }
  0x18   : > { %s174_s5 = ssub.s32 (%p36_p5), 10, %s787_s29  ;;  %s1078_s8 = scalar_lea.sflag (%p36_p5), [#allocation3], %s168_s28 }
  0x19   : > { %p175_p12 = scmp.lt.s32.totalorder (%p36_p5), %s174_s5, 4  ;;  %s172_s9 = scalar_lea.vmem (%p36_p5), [#allocation2], %s811_s30 }
  0x1d   : > { %s1571_s5 = smov (!%p175_p12, %s174_s5), 4 }
  0x1e   : > { %s1075_s6 = smul.u32 384, %s1571_s5 }
  0x20   : > { %s180_s7 = ssub.s32 1536, %s1075_s6 }
  0x21   : > { %181 = vsyncadd %s1078_s8, %s180_s7  ;;  %p790_p13 = scmp.ne.s32.totalorder %s1075_s6, 0  ;;  %s812_s10 = smul.u32 1536, %s988_s18 }
  0x22   : > { %s187_s11 = sshll.u32 %s172_s9, 4  ;;  %s898_s28 = scalar_lea.hbm %s1509_s0, 3840  ;;  %s1088_s11 = int_to_ptr.vmem [resolvable:$true] %s187_s11 }
  0x23   : > { %s1086_s14 = scalar_lea.hbm %s1509_s0, %s812_s10 }
  0x24   : > { %s894_s20 = scalar_lea.hbm %s1086_s14, %s1075_s6  ;;  %p899_p3 = scmp.lt.u32.totalorder %s1086_s14, %s1509_s0 }
  0x25   : > { %p895_p0 = scmp.ne.s32.totalorder %s1086_s14, %s894_s20  ;;  %p900_p4 = scmp.lt.u32.totalorder %s898_s28, %s894_s20 }
  0x26   : > { %p902_p7 = scmp.lt.u32.totalorder %s894_s20, %s1086_s14 }
  0x27   : > { %p896_p1 = pnand %p895_p0, %p790_p13  ;;  %p901_p5 = por %p900_p4, %p899_p3 }
  0x29   : > { %p897_p2 = pneg %p896_p1  ;;  %p903_p8 = por %p902_p7, %p901_p5 }
  0x2b   : > { %p904_p11 = pnand %p903_p8, %p897_p2 }
  0x2d   : > { %907 = shalt.err (!%p904_p11)
}
  0x2e   : > { %s908_s5 = scalar_lea.vmem %s1088_s11, %s1075_s6  ;;  %s990_s7 = smov [#allocation2]  }
  0x2f   : > { %p909_p12 = scmp.ne.s32.totalorder %s1088_s11, %s908_s5  ;;  %s912_s9 = sshll.u32 %s990_s7, 4  ;;  %s913_s9 = int_to_ptr.vmem [resolvable:$false] %s912_s9 }
  0x30   : > { %s914_s10 = scalar_lea.vmem %s913_s9, 3072  ;;  %p915_p10 = scmp.lt.s32.totalorder %s1088_s11, %s913_s9 }
  0x31   : > { %p910_p0 = pnand %p909_p12, %p790_p13  ;;  %p916_p3 = scmp.lt.s32.totalorder %s914_s10, %s908_s5 }
  0x33   : > { %p911_p1 = pneg %p910_p0  ;;  %p917_p4 = por %p916_p3, %p915_p10 }
  0x35   : > { %p918_p5 = pnand %p917_p4, %p911_p1 }
  0x37   : > { %921 = shalt.err (!%p918_p5)
}
  0x38   : > { %s991_s12 = smov 384   ;;  %s992_s13 = smov 24  }
  0x39   : > { %193 = dma.hbm_to_vmem [thread:$0]  (%p790_p13), %s1086_s14, %s1075_s6, %s1088_s11, %s1078_s8, %s991_s12, %s991_s12, %s992_s13  }
  0x3a PF: > { %p794_p2 = scmp.ge.s32.totalorder %s988_s18, 1  ;;  %p233_p7 = scmp.lt.s32.totalorder %s988_s18, 4 }
  0x3c   : > { %p234_p8 = pnand %p794_p2, %p233_p7 }
  0x3d   : > { %s1118_s20 = sand.u32 (!%p234_p8), 1, %s980_s16  }
  0x3e   : > { %237 = sbr.rel (%p234_p8) target bundleno = 776 (0x308), region = 36  ;;  %s240_s23 = scalar_lea.sflag (!%p234_p8), [#allocation3], %s1118_s20 }
  0x3f   : > { %s813_s22 = smul.u32 (!%p234_p8), 96, %s1118_s20 }
  0x41   : > { %s1122_s28 = scalar_lea.vmem (!%p234_p8), [#allocation2], %s813_s22 }
  0x45   : > { %967 = dma.done.wait (%p1059_p6), %s240_s23, 1536  }
  0x46   : > { %969 = vsyncadd (%p1059_p6), %s240_s23, 4294965760  ;;  %s796_s6 = sshll.u32 %s1041_s19, 2  ;;  %v993_v0 = vmov 0   ;;  %v1159_v25 = vld [vmem:[%s1122_s28 + $0x30] sm:$0xff]  ;;  %v1162_v26 = vld [vmem:[%s1122_s28 + $0x38] sm:$0xff]  ;;  %v350_v41 = vlaneseq  ;;  %s806_s22 = sshll.u32 %s1041_s19, 5 }
  0x47   : > { %861 = vset.pattern.permute.xlu1 %v993_v0  ;;  %860 = vset.pattern.permute.xlu0 %v993_v0  ;;  %p301_p10 = scmp.lt.s32.totalorder %s796_s6, 9  ;;  %p313_p13 = scmp.lt.s32.totalorder %s796_s6, 11  ;;  %v1165_v27 = vld [vmem:[%s1122_s28 + $0x40] sm:$0xff]  ;;  %v460_v29 = vmul.f32 1.012, %v1159_v25  ;;  %v1174_v35 = vld [vmem:[%s1122_s28 + $0x8] sm:$0xff] }
  0x48   : > { %v1169_v32 = vld [vmem:[%s1122_s28] sm:$0xff]  ;;  %v461_v33 = vmul.f32 1.012, %v1162_v26  ;;  %v462_v34 = vmul.f32 1.012, %v1165_v27  ;;  %v1177_v36 = vld [vmem:[%s1122_s28 + $0x10] sm:$0xff] }
  0x49   : > { %s302_s8 = scalar_select %p301_p10, %s796_s6, 9  ;;  %v1183_v39 = vadd.f32 0.012, %v460_v29  ;;  %v454_v40 = vmul.f32 1.012, %v1169_v32  ;;  %v1201_v50 = vld [vmem:[%s1122_s28 + $0x18] sm:$0xff] }
  0x4a   : > { %s1573_s6 = smov (!%p313_p13, %s796_s6), 11  ;;  %v455_v44 = vmul.f32 1.012, %v1174_v35  ;;  %v456_v45 = vmul.f32 1.012, %v1177_v36  ;;  %v1211_v53 = vld [vmem:[%s1122_s28 + $0x20] sm:$0xff] }
  0x4b   : > { %s814_s11 = smul.u32 6, %s302_s8  ;;  %s799_s14 = sshll.u32 %s1573_s6, 3  ;;  %v1196_v46 = vadd.f32 0.012, %v461_v33  ;;  %v1198_v47 = vadd.f32 0.012, %v462_v34 }
  0x4c   : > { %s322_s5 = scalar_lea.vmem %s1512_s3, %s799_s14  ;;  %s1135_s25 = scalar_lea.vmem %s1511_s2, %s799_s14  ;;  %v1214_v54 = vld [vmem:[%s1122_s28 + $0x28] sm:$0xff]  ;;  %v1222_v59 = vadd.f32 0.012, %v454_v40  ;;  %v1228_v62 = vld [vmem:[%s1122_s28 + $0x50] sm:$0xff]  ;;  %v1230_v63 = vadd.f32 0.012, %v455_v44 }
  0x4d   : > { %v348_v1 = vld [vmem:[%s322_s5 + $0x10] sm:$0xff]  ;;  %v346_v2 = vld [vmem:[%s322_s5] sm:$0xff]  ;;  %s305_s13 = scalar_lea.vmem %s1510_s1, %s814_s11  ;;  %v347_v3 = vld [vmem:[%s322_s5 + $0x8] sm:$0xff]  ;;  %s795_s23 = sshll.u32 %s1118_s20, 3 }
  0x4e   : > { %434 = vperm.xlu1 %861, %v348_v1   ;;  %424 = vperm.xlu0 %860, %v346_v2   ;;  %v342_v4 = vld [vmem:[%s1135_s25] sm:$0xff]  ;;  %v340_v5 = vld [vmem:[%s305_s13 + $0xc] sm:$0x3f]  ;;  %v802_v6 = vadd.f32 -0.1, %v346_v2  ;;  %v349_v9 = vld [vmem:[%s322_s5 + $0x18] sm:$0xff] }
  0x4f   : > { %v803_v7 = vadd.f32 -0.1, %v347_v3  ;;  %vm380_vm0 = vnez %v340_v5  ;;  %v343_v8 = vld [vmem:[%s1135_s25 + $0x8] sm:$0xff]  ;;  %v338_v11 = vld [vmem:[%s305_s13] sm:$0x3f]  ;;  %v344_v21 = vld [vmem:[%s1135_s25 + $0x10] sm:$0xff] }
  0x50   : > { %v384_v10 = vsel %vm380_vm0, 16843009, %v993_v0  ;;  %v804_v12 = vadd.f32 -0.1, %v348_v1  ;;  %vm378_vm1 = vnez %v338_v11  ;;  %v1142_v13 = vmul.f32 16.0, %v802_v6  ;;  %v345_v23 = vld [vmem:[%s1135_s25 + $0x18] sm:$0xff] }
  0x51   : > { %v1144_v14 = vmul.f32 16.0, %v803_v7  ;;  %v382_v15 = vsel %vm378_vm1, 16843009, %v993_v0  ;;  %v339_v16 = vld [vmem:[%s305_s13 + $0x6] sm:$0x3f]  ;;  %v392_v28 = vunpack.c.0.s8 %v384_v10  ;;  %v393_v30 = vunpack.c.1.s8 %v384_v10  ;;  %s808_s8 = sshll.u32 %s1041_s19, 7 }
  0x52   : > { %429 = vperm.xlu0 %860, %v347_v3   ;;  %355 = vperm.xlu1 %861, %v342_v4   ;;  %v1146_v17 = vmul.f32 16.0, %v804_v12  ;;  %vm379_vm2 = vnez %v339_v16  ;;  %v805_v18 = vadd.f32 -0.1, %v349_v9  ;;  %v341_v20 = vld [vmem:[%s305_s13 + $0x12] sm:$0x3f]  ;;  %v394_v31 = vunpack.c.2.s8 %v384_v10  ;;  %v1225_v61 = vld [vmem:[%s1122_s28 + $0x48] sm:$0xff]  ;;  %s1468_s30 = scalar_lea.hbm %s1513_s4, %s808_s8 }
  0x53   : > { %v383_v19 = vsel %vm379_vm2, 16843009, %v993_v0  ;;  %vm381_vm3 = vnez %v341_v20  ;;  %v386_v37 = vunpack.c.0.s8 %v382_v15  ;;  %vm1179_vm4 = vcmp.ne.s32.totalorder %v392_v28, 0  ;;  %v1260_v10 = vld [vmem:[%s1122_s28 + $0x58] sm:$0xff]  ;;  %s288_s28 = scalar_lea.vmem [#allocation5], %s795_s23  ;;  %s665_s5 = scalar_lea.sflag [#allocation4], %s1118_s20 }
  0x54   : > { %v1151_v22 = vmul.f32 16.0, %v805_v18  ;;  %v1155_v24 = vsel %vm381_vm3, 16843009, %v993_v0  ;;  %vm1186_vm5 = vcmp.ne.s32.totalorder %v393_v30, 0  ;;  %vm1190_vm6 = vcmp.ne.s32.totalorder %v394_v31, 0  ;;  %s678_s6 = sshll.u32 %s288_s28, 4  ;;  %s1463_s6 = int_to_ptr.vmem [resolvable:$true] %s678_s6 }
  0x55   : > { %v387_v48 = vunpack.c.1.s8 %v382_v15  ;;  %v388_v49 = vunpack.c.2.s8 %v382_v15  ;;  %v416_v51 = vsel %vm1179_vm4, %v1159_v25, -10000.0  ;;  %vm1206_vm7 = vcmp.ne.s32.totalorder %v386_v37, 0  ;;  %s922_s7 = scalar_lea.vmem %s1463_s6, 128  ;;  %s994_s19 = smov [#allocation5]  }
  0x56   : > { %358 = vperm.xlu0 %860, %v343_v8   ;;  %439 = vperm.xlu1 %861, %v349_v9   ;;  %v389_v55 = vunpack.c.0.s8 %v383_v19  ;;  %v390_v56 = vunpack.c.1.s8 %v383_v19  ;;  %v417_v57 = vsel %vm1186_vm5, %v1162_v26, -10000.0  ;;  %v418_v58 = vsel %vm1190_vm6, %v1165_v27, -10000.0  ;;  %p923_p6 = scmp.ne.s32.totalorder %s1463_s6, %s922_s7  ;;  %s926_s9 = sshll.u32 %s994_s19, 4  ;;  %s927_s9 = int_to_ptr.vmem [resolvable:$false] %s926_s9 }
  0x57   : > { %v391_v60 = vunpack.c.2.s8 %v383_v19  ;;  %v1232_v0 = vadd.f32 0.012, %v456_v45  ;;  %v457_v1 = vmul.f32 1.012, %v1201_v50  ;;  %vm1235_vm8 = vcmp.ne.s32.totalorder %v387_v48, 0  ;;  %s928_s25 = scalar_lea.vmem %s927_s9, 256  ;;  %p929_p0 = scmp.lt.s32.totalorder %s1463_s6, %s927_s9 }
  0x58   : > { %vm1239_vm9 = vcmp.ne.s32.totalorder %v388_v49, 0  ;;  %v410_v4 = vsel %vm1206_vm7, %v1169_v32, -10000.0  ;;  %v458_v5 = vmul.f32 1.012, %v1211_v53  ;;  %vm1247_vm10 = vcmp.ne.s32.totalorder %v389_v55, 0  ;;  %p924_p11 = pnand %p923_p6, %p1064_p9  ;;  %p930_p1 = scmp.lt.s32.totalorder %s928_s25, %s922_s7 }
  0x59   : > { %vm1251_vm11 = vcmp.ne.s32.totalorder %v390_v56, 0  ;;  %v459_v8 = vmul.f32 1.012, %v1214_v54  ;;  %v1257_v9 = vand.u32 127, %v350_v41  ;;  %vm1262_vm12 = vcmp.ne.s32.totalorder %v391_v60, 0 }
  0x5a   : > { %512 = vperm.xlu0 %860, %v1142_v13   ;;  %517 = vperm.xlu1 %861, %v1144_v14   ;;  %v395_v12 = vunpack.c.0.s8 %v1155_v24  ;;  %v463_v15 = vmul.f32 1.012, %v1225_v61  ;;  %v464_v16 = vmul.f32 1.012, %v1228_v62  ;;  %v411_v20 = vsel %vm1235_vm8, %v1174_v35, -10000.0  ;;  %p925_p12 = pneg %p924_p11  ;;  %p931_p3 = por %p930_p1, %p929_p0 }
  0x5b   : > { %v396_v28 = vunpack.c.1.s8 %v1155_v24  ;;  %v413_v29 = vsel %vm1247_vm10, %v1201_v50, -10000.0  ;;  %v414_v30 = vsel %vm1251_vm11, %v1211_v53, -10000.0  ;;  %v397_v31 = vunpack.c.2.s8 %v1155_v24 }
  0x5c   : > { %v465_v33 = vmul.f32 1.012, %v1260_v10  ;;  %v415_v34 = vsel %vm1262_vm12, %v1214_v54, -10000.0  ;;  %v470_v37 = vadd.f32 0.012, %v458_v5  ;;  %v1288_v40 = vadd.s32 128, %v1257_v9  ;;  %p932_p4 = pnand %p931_p3, %p925_p12 }
  0x5d   : > { %v471_v38 = vadd.f32 0.012, %v459_v8  ;;  %v1291_v42 = vadd.s32 256, %v1257_v9  ;;  %vm1293_vm13 = vcmp.ne.s32.totalorder %v395_v12, 0  ;;  %v1297_v44 = vadd.f32 0.012, %v463_v15 }
  0x5e   : > { %361 = vperm.xlu0 %860, %v344_v21   ;;  %522 = vperm.xlu1 %861, %v1146_v17   ;;  %v412_v21 = vsel %vm1239_vm9, %v1177_v36, -10000.0  ;;  %v1299_v24 = vadd.f32 0.012, %v464_v16  ;;  %vm1313_vm1 = vcmp.ne.s32.totalorder %v396_v28, 0  ;;  %vm1325_vm4 = vcmp.ne.s32.totalorder %v397_v31, 0 }
  0x5f   : > { %v1329_v3 = vadd.f32 0.012, %v465_v33  ;;  %v419_v8 = vsel %vm1293_vm13, %v1225_v61, -10000.0 }
  0x62   : > { %364 = vperm.xlu0 %860, %v345_v23   ;;  %527 = vperm.xlu1 %861, %v1151_v22   ;;  %v469_v23 = vadd.f32 0.012, %v457_v1 }
  0xcd   : > { %v435_v18 = vpop.permute.xlu1 %434  ;;  %v425_v19 = vpop.permute.xlu0 %424 }
  0xce   : > { %vm1301_vm14 = vcmp.ge.f32.partialorder %v410_v4, %v425_v19  ;;  %vm1305_vm15 = vcmp.ge.f32.partialorder %v411_v20, %v425_v19  ;;  %vm1309_vm0 = vcmp.ge.f32.partialorder %v412_v21, %v425_v19  ;;  %vm1317_vm2 = vcmp.ge.f32.partialorder %v416_v51, %v435_v18 }
  0xcf   : > { %vm1331_vm5 = vcmp.ge.f32.partialorder %v417_v57, %v435_v18  ;;  %vm1335_vm6 = vcmp.ge.f32.partialorder %v418_v58, %v435_v18  ;;  %v478_v57 = vsel %vm1301_vm14, %v1222_v59, %v1169_v32  ;;  %v479_v58 = vsel %vm1305_vm15, %v1230_v63, %v1174_v35 }
  0xd0   : > { %v480_v7 = vsel %vm1309_vm0, %v1232_v0, %v1177_v36  ;;  %v420_v36 = vsel %vm1313_vm1, %v1228_v62, -10000.0  ;;  %v484_v0 = vsel %vm1317_vm2, %v1183_v39, %v1159_v25  ;;  %v498_v12 = vmul.f32 16.0, %v478_v57 }
  0xd1   : > { %v430_v52 = vpop.permute.xlu0 %429  ;;  %v356_v55 = vpop.permute.xlu1 %355  ;;  %v499_v15 = vmul.f32 16.0, %v479_v58  ;;  %v500_v16 = vmul.f32 16.0, %v480_v7 }
  0xd2   : > { %vm1321_vm3 = vcmp.ge.f32.partialorder %v413_v29, %v430_v52  ;;  %vm1339_vm7 = vcmp.ge.f32.partialorder %v414_v30, %v430_v52  ;;  %vm1343_vm8 = vcmp.ge.f32.partialorder %v415_v34, %v430_v52  ;;  %vm366_vm9 = vcmp.eq.s32.totalorder %v1257_v9, %v356_v55 }
  0xd3   : > { %v481_v11 = vsel %vm1321_vm3, %v469_v23, %v1201_v50  ;;  %v482_v32 = vsel %vm1339_vm7, %v470_v37, %v1211_v53  ;;  %v483_v35 = vsel %vm1343_vm8, %v471_v38, %v1214_v54  ;;  %v485_v50 = vsel %vm1331_vm5, %v1196_v46, %v1162_v26 }
  0xd4   : > { %v486_v53 = vsel %vm1335_vm6, %v1198_v47, %v1165_v27  ;;  %v421_v54 = vsel %vm1325_vm4, %v1260_v10, -10000.0  ;;  %v501_v25 = vmul.f32 16.0, %v481_v11  ;;  %v502_v39 = vmul.f32 16.0, %v482_v32 }
  0xd5   : > { %v359_v59 = vpop.permute.xlu0 %358  ;;  %v440_v63 = vpop.permute.xlu1 %439  ;;  %v503_v18 = vmul.f32 16.0, %v483_v35  ;;  %vm367_vm10 = vcmp.eq.s32.totalorder %v1288_v40, %v356_v55  ;;  %vm368_vm11 = vcmp.eq.s32.totalorder %v1291_v42, %v356_v55  ;;  %v504_v30 = vmul.f32 16.0, %v484_v0 }
  0xd6   : > { %vm369_vm12 = vcmp.eq.s32.totalorder %v1257_v9, %v359_v59  ;;  %vm370_vm13 = vcmp.eq.s32.totalorder %v1288_v40, %v359_v59  ;;  %vm1394_vm14 = vcmp.ge.f32.partialorder %v419_v8, %v440_v63  ;;  %vm371_vm15 = vcmp.eq.s32.totalorder %v1291_v42, %v359_v59 }
  0xd7   : > { %vm1399_vm0 = vcmp.ge.f32.partialorder %v420_v36, %v440_v63  ;;  %v505_v31 = vmul.f32 16.0, %v485_v50  ;;  %vm1405_vm1 = vcmp.ge.f32.partialorder %v421_v54, %v440_v63  ;;  %v487_v38 = vsel %vm1394_vm14, %v1297_v44, %v1225_v61 }
  0xd8   : > { %v488_v52 = vsel %vm1399_vm0, %v1299_v24, %v1228_v62  ;;  %v506_v55 = vmul.f32 16.0, %v486_v53  ;;  %v489_v61 = vsel %vm1405_vm1, %v1329_v3, %v1260_v10  ;;  %v507_v1 = vmul.f32 16.0, %v487_v38 }
  0xd9   : > { %v513_v27 = vpop.permute.xlu0 %512  ;;  %v518_v46 = vpop.permute.xlu1 %517  ;;  %v508_v2 = vmul.f32 16.0, %v488_v52  ;;  %v509_v51 = vmul.f32 16.0, %v489_v61 }
  0xda   : > { %v530_v47 = vsel %vm366_vm9, %v513_v27, %v498_v12  ;;  %v531_v19 = vsel %vm367_vm10, %v513_v27, %v499_v15  ;;  %v533_v20 = vsel %vm369_vm12, %v518_v46, %v501_v25  ;;  %v534_v21 = vsel %vm370_vm13, %v518_v46, %v502_v39 }
  0xdb   : > { %v546_v28 = vmax.f32 %v533_v20, %v534_v21  ;;  %v542_v29 = vmax.f32 %v530_v47, %v531_v19  ;;  %v535_v33 = vsel %vm371_vm15, %v518_v46, %v503_v18  ;;  %v532_v34 = vsel %vm368_vm11, %v513_v27, %v500_v16 }
  0xdc   : > { %vm645_vm10 = vcmask 7168  }
  0xdd   : > { %v362_v43 = vpop.permute.xlu0 %361  ;;  %v523_v45 = vpop.permute.xlu1 %522  ;;  %v547_v48 = vmax.f32 %v546_v28, %v535_v33  ;;  %v543_v49 = vmax.f32 %v542_v29, %v532_v34 }
  0xde   : > { %vm372_vm2 = vcmp.eq.s32.totalorder %v1257_v9, %v362_v43  ;;  %vm373_vm3 = vcmp.eq.s32.totalorder %v1288_v40, %v362_v43  ;;  %vm374_vm4 = vcmp.eq.s32.totalorder %v1291_v42, %v362_v43 }
  0xdf   : > { %v536_v56 = vsel %vm372_vm2, %v523_v45, %v504_v30  ;;  %v537_v60 = vsel %vm373_vm3, %v523_v45, %v505_v31  ;;  %548 = vmax.xlane.f32.xlu1 %v547_v48  ;;  %544 = vmax.xlane.f32.xlu0 %v543_v49  ;;  %v538_v4 = vsel %vm374_vm4, %v523_v45, %v506_v55 }
  0xe0   : > { %v550_v44 = vmax.f32 %v536_v56, %v537_v60 }
  0xe1   : > { %v365_v62 = vpop.permute.xlu0 %364  ;;  %v528_v24 = vpop.permute.xlu1 %527 }
  0xe2   : > { %vm375_vm5 = vcmp.eq.s32.totalorder %v1257_v9, %v365_v62  ;;  %vm376_vm6 = vcmp.eq.s32.totalorder %v1288_v40, %v365_v62  ;;  %vm377_vm7 = vcmp.eq.s32.totalorder %v1291_v42, %v365_v62  ;;  %v551_v5 = vmax.f32 %v550_v44, %v538_v4 }
  0xe3   : > { %v539_v6 = vsel %vm375_vm5, %v528_v24, %v507_v1  ;;  %v540_v57 = vsel %vm376_vm6, %v528_v24, %v508_v2  ;;  %v541_v7 = vsel %vm377_vm7, %v528_v24, %v509_v51  ;;  %v628_v24 = vshrl.u32 %v350_v41, 7 }
  0xe4   : > { %552 = vmax.xlane.f32.xlu0 %v551_v5  ;;  %v554_v58 = vmax.f32 %v539_v6, %v540_v57 }
  0xe5   : > { %v629_v5 = vadd.s32 8, %v628_v24 }
  0xe6   : > { %v555_v10 = vmax.f32 %v554_v58, %v541_v7 }
  0xe8   : > { %556 = vmax.xlane.f32.xlu0 %v555_v10 }
 0x16c   : > { %v1427_v3 = vpop.xlane.xlu1 %548  ;;  %v1429_v8 = vpop.xlane.xlu0 %544 }
 0x16d   : > { %v561_v11 = vsub.f32 %v533_v20, %v1427_v3  ;;  %v562_v9 = vsub.f32 %v534_v21, %v1427_v3  ;;  %v563_v40 = vsub.f32 %v535_v33, %v1427_v3  ;;  %v558_v42 = vsub.f32 %v530_v47, %v1429_v8 }
 0x16e   : > { %v559_v32 = vsub.f32 %v531_v19, %v1429_v8  ;;  %v560_v35 = vsub.f32 %v532_v34, %v1429_v8 }
 0x16f   : > { %v576_v59 = vmul.f32 1.442695, %v561_v11  ;;  %v578_v63 = vmul.f32 1.442695, %v562_v9  ;;  %v580_v36 = vmul.f32 1.442695, %v563_v40 }
 0x170   : > { %v570_v0 = vmul.f32 1.442695, %v558_v42  ;;  %v572_v50 = vmul.f32 1.442695, %v559_v32  ;;  %v574_v53 = vmul.f32 1.442695, %v560_v35 }
 0x171   : > { %862 = vpow2.f32 %v576_v59  ;;  %v1437_v54 = vpop.xlane.xlu0 %552  ;;  %v630_v9 = vadd.s32 16, %v628_v24  ;;  %v631_v35 = vadd.s32 24, %v628_v24 }
 0x172   : > { %864 = vpow2.f32 %v578_v63  ;;  %v564_v12 = vsub.f32 %v536_v56, %v1437_v54  ;;  %v565_v15 = vsub.f32 %v537_v60, %v1437_v54  ;;  %v566_v16 = vsub.f32 %v538_v4, %v1437_v54 }
 0x173   : > { %866 = vpow2.f32 %v580_v36 }
 0x174   : > { %868 = vpow2.f32 %v570_v0  ;;  %v582_v25 = vmul.f32 1.442695, %v564_v12  ;;  %v584_v39 = vmul.f32 1.442695, %v565_v15  ;;  %v586_v18 = vmul.f32 1.442695, %v566_v16 }
 0x175   : > { %870 = vpow2.f32 %v572_v50  ;;  %v1442_v26 = vpop.xlane.xlu0 %556 }
 0x176   : > { %872 = vpow2.f32 %v574_v53  ;;  %v567_v27 = vsub.f32 %v539_v6, %v1442_v26  ;;  %v568_v46 = vsub.f32 %v540_v57, %v1442_v26  ;;  %v569_v47 = vsub.f32 %v541_v7, %v1442_v26 }
 0x177   : > { %874 = vpow2.f32 %v582_v25  ;;  %v632_v6 = vstv %s806_s22 }
 0x178   : > { %876 = vpow2.f32 %v584_v39  ;;  %v588_v19 = vmul.f32 1.442695, %v567_v27  ;;  %v590_v20 = vmul.f32 1.442695, %v568_v46  ;;  %v592_v21 = vmul.f32 1.442695, %v569_v47 }
 0x179   : > { %878 = vpow2.f32 %v586_v18  ;;  %v634_v7 = vadd.s32 %v632_v6, %v629_v5  ;;  %v633_v40 = vadd.s32 %v632_v6, %v628_v24  ;;  %v635_v63 = vadd.s32 %v632_v6, %v630_v9 }
 0x17a   : > { %880 = vpow2.f32 %v588_v19  ;;  %v636_v12 = vadd.s32 %v632_v6, %v631_v35 }
 0x17b   : > { %v863_v23 = vpop.eup %862  ;;  %882 = vpow2.f32 %v590_v20  ;;  %vm638_vm8 = vcmp.lt.s32.totalorder %v634_v7, 80  ;;  %vm637_vm9 = vcmp.lt.s32.totalorder %v633_v40, 80  ;;  %vm639_vm11 = vcmp.lt.s32.totalorder %v635_v63, 80 }
 0x17c   : > { %v865_v28 = vpop.eup %864  ;;  %884 = vpow2.f32 %v592_v21  ;;  %vm640_vm12 = vcmp.lt.s32.totalorder %v636_v12, 80 }
 0x17d   : > { %v867_v29 = vpop.eup %866  ;;  %v598_v30 = vadd.f32 %v865_v28, %v863_v23 }
 0x17e   : > { %v869_v31 = vpop.eup %868 }
 0x17f   : > { %v871_v33 = vpop.eup %870  ;;  %v599_v34 = vadd.f32 %v867_v29, %v598_v30 }
 0x180   : > { %v873_v37 = vpop.eup %872  ;;  %v594_v38 = vadd.f32 %v871_v33, %v869_v31 }
 0x181   : > { %v875_v43 = vpop.eup %874  ;;  %600 = vadd.xlane.f32.xlu0 %v599_v34 }
 0x182   : > { %v877_v45 = vpop.eup %876  ;;  %v595_v48 = vadd.f32 %v873_v37, %v594_v38 }
 0x183   : > { %v879_v49 = vpop.eup %878  ;;  %v602_v52 = vadd.f32 %v877_v45, %v875_v43 }
 0x184   : > { %v881_v55 = vpop.eup %880  ;;  %596 = vadd.xlane.f32.xlu1 %v595_v48 }
 0x185   : > { %v883_v56 = vpop.eup %882  ;;  %v603_v60 = vadd.f32 %v879_v49, %v602_v52 }
 0x186   : > { %v606_v61 = vadd.f32 %v883_v56, %v881_v55  ;;  %v885_v44 = vpop.eup %884 }
 0x188   : > { %604 = vadd.xlane.f32.xlu1 %v603_v60  ;;  %v607_v1 = vadd.f32 %v885_v44, %v606_v61 }
 0x18a   : > { %608 = vadd.xlane.f32.xlu0 %v607_v1 }
 0x20e   : > { %v601_v2 = vpop.xlane.xlu0 %600 }
 0x20f   : > { %886 = vlog2.f32 %v601_v2 }
 0x211   : > { %v597_v62 = vpop.xlane.xlu1 %596 }
 0x212   : > { %888 = vlog2.f32 %v597_v62 }
 0x215   : > { %v605_v4 = vpop.xlane.xlu1 %604 }
 0x216   : > { %890 = vlog2.f32 %v605_v4 }
 0x217   : > { %v609_v51 = vpop.xlane.xlu0 %608 }
 0x218   : > { %892 = vlog2.f32 %v609_v51 }
 0x219   : > { %v887_v57 = vpop.eup %886 }
 0x21a   : > { %v613_v58 = vmul.f32 0.6931472, %v887_v57 }
 0x21c   : > { %v889_v10 = vpop.eup %888  ;;  %v619_v11 = vadd.f32 %v613_v58, %v1427_v3 }
 0x21d   : > { %v611_v42 = vmul.f32 0.6931472, %v889_v10 }
 0x21e   : > { %v623_v32 = vsub.f32 %v619_v11, %v1144_v14 }
 0x21f   : > { %v618_v41 = vadd.f32 %v611_v42, %v1429_v8 }
 0x220   : > { %v891_v59 = vpop.eup %890  ;;  %v642_v50 = vsel %vm638_vm8, %v623_v32, 0.0 }
 0x221   : > { %v622_v36 = vsub.f32 %v618_v41, %v1142_v13  ;;  %v615_v0 = vmul.f32 0.6931472, %v891_v59  ;;  %v647_v25 = vsel %vm645_vm10, %v642_v50, 0.0 }
 0x222   : > { %v893_v53 = vpop.eup %892 }
 0x223   : > { %v620_v3 = vadd.f32 %v615_v0, %v1437_v54  ;;  %v617_v15 = vmul.f32 0.6931472, %v893_v53  ;;  %v641_v16 = vsel %vm637_vm9, %v622_v36, 0.0 }
 0x224   : > { %v646_v14 = vsel %vm645_vm10, %v641_v16, 0.0 }
 0x225   : > { %v624_v8 = vsub.f32 %v620_v3, %v1146_v17  ;;  %v621_v39 = vadd.f32 %v617_v15, %v1442_v26  ;;  %v648_v27 = vadd.f32 %v647_v25, %v646_v14 }
 0x227   : > { %v625_v13 = vsub.f32 %v621_v39, %v1151_v22  ;;  %v643_v18 = vsel %vm639_vm11, %v624_v8, 0.0 }
 0x228   : > { %v649_v46 = vsel %vm645_vm10, %v643_v18, 0.0 }
 0x229   : > { %v644_v54 = vsel %vm640_vm12, %v625_v13, 0.0  ;;  %v650_v47 = vadd.f32 %v649_v46, %v648_v27 }
 0x22a   : > { %v651_v19 = vsel %vm645_vm10, %v644_v54, 0.0 }
 0x22b   : > { %v652_v20 = vadd.f32 %v651_v19, %v650_v47 }
 0x22d   : > { %653 = vadd.xlane.f32.xlu1 %v652_v20 }
 0x2ba   : > { %v654_v21 = vpop.xlane.xlu1 %653 }
 0x2bb   : > { %v655_v23 = vrot.slane %v654_v21, 4 }
 0x2bd   : > { %v656_v17 = vadd.f32 %v655_v23, %v654_v21 }
 0x2bf   : > { %v657_v26 = vrot.slane %v656_v17, 2 }
 0x2c1   : > { %v658_v28 = vadd.f32 %v657_v26, %v656_v17 }
 0x2c3   : > { %v659_v22 = vrot.slane %v658_v28, 1 }
 0x2c5   : > { %v660_v29 = vadd.f32 %v659_v22, %v658_v28 }
 0x2c7   : > { %815 = vpush %v660_v29 }
 0x2f8   : > { %s816_s11 = spop %815 }
 0x2f9   : > { %v662_v30 = vstv %s816_s11 }
 0x2fa   : > { %663 = vst [vmem:[%s288_s28] sm:$0xff] %v662_v30 }
 0x2fb   : > { %935 = shalt.err (!%p932_p4)
}
 0x2fc   : > { %s936_s20 = scalar_lea.hbm %s1468_s30, 128  ;;  %s940_s13 = scalar_lea.hbm %s1513_s4, 384 }
 0x2fd   : > { %p937_p5 = scmp.ne.s32.totalorder %s1468_s30, %s936_s20  ;;  %p941_p8 = scmp.lt.u32.totalorder %s1468_s30, %s1513_s4 }
 0x2fe   : > { %p942_p10 = scmp.lt.u32.totalorder %s940_s13, %s936_s20  ;;  %p944_p6 = scmp.lt.u32.totalorder %s936_s20, %s1468_s30 }
 0x2ff   : > { %p938_p2 = pnand %p937_p5, %p1064_p9 }
 0x300   : > { %p943_p13 = por %p942_p10, %p941_p8 }
 0x301   : > { %p939_p7 = pneg %p938_p2 }
 0x302   : > { %p945_p11 = por %p944_p6, %p943_p13 }
 0x304   : > { %p946_p12 = pnand %p945_p11, %p939_p7 }
 0x306   : > { %949 = shalt.err (!%p946_p12)
}
 0x307   : > { %818 = dma.vmem_to_hbm [thread:$0]  (%p1064_p9), %s1463_s6, 128, %s1468_s30, %s665_s5  }
 0x308 PF: > { %p824_p0 = scmp.ge.s32.totalorder %s988_s18, 2  ;;  %s690_s28 = sand.u32 1, %s976_s15  }
 0x309   : > { %p1565_p1 = scmp.ne.s32.totalorder %s1516_s27, 0  ;;  %s691_s8 = scalar_lea.sflag [#allocation4], %s690_s28 }
 0x30b   : > { %p821_p3 = pnand %p824_p0, %p1565_p1 }
 0x30d   : > { %971 = dma.done.wait (!%p821_p3), %s691_s8, 128  }
 0x30e   : > { %973 = vsyncadd (!%p821_p3), %s691_s8, 4294967168  ;;  %p17_p4 = scmp.ge.s32.totalorder %s1045_s21, 5   ;;  %s1566_s15 = smov %s980_s16 }
 0x30f   : > { %s1567_s16 = smov %s984_s17  ;;  %s1568_s17 = smov %s1057_s24 }
 0x310   : > { %s1569_s18 = smov %s1045_s21  ;;  %19 = sbr.rel (!%p17_p4) target bundleno = 5 (0x5), region = 90 }
 0x317   :  { %696 = vsyncpa [#allocation3], 1 }
 0x318   :  { %698 = vsyncpa [#allocation3 + $0x1], 1 }
 0x319   :  { %699 = vsyncpa [#allocation4], 1 }
 0x31a   :  { %701 = vsyncpa [#allocation4 + $0x1], 1 }

</bundles_post_ra>
